<compile_context>
chip_gen: v5e
topology: v5e:2x2
jax: 0.10.0
libtpu: 0.0.40
codegen_flags: <defaults>
</compile_context>

<pallas_src>
import jax
import jax.numpy as jnp
from jax.experimental import pallas as pl
from jax.experimental.pallas import tpu as pltpu


def _cdiv(a, b):
    return -(-a // b)


def _round_up(a, m):
    return _cdiv(a, m) * m


def _attention_kernel(x_ref, w_ref, b_ref, o_ref):
    """One (tb, C, ts, L) tile.

    x_ref, o_ref : (tb, C, ts, L) in the I/O dtype (VMEM)
    w_ref        : (C,) f32 1x1-conv weights (SMEM)
    b_ref        : (1,) f32 conv bias        (SMEM)
    """
    C = x_ref.shape[1]
    # 1x1 conv with a single output channel == per-pixel weighted channel sum:
    # C scalar*vector FMAs over full (ts, L) vregs, accumulated in f32 without
    # materializing a full f32 copy of the block.
    acc = x_ref[:, 0, :, :].astype(jnp.float32) * w_ref[0]
    for c in range(1, C):
        acc = acc + x_ref[:, c, :, :].astype(jnp.float32) * w_ref[c]
    logits = acc + b_ref[0]
    # sigmoid(z) = 1 / (1 + exp(-z)); exp and the approximate reciprocal both
    # land on the EUP slot (free alongside VPU / load-store work).
    att = pl.reciprocal(1.0 + jnp.exp(-logits), approx=True)
    gate = att.astype(o_ref.dtype)                   # (tb, ts, L)
    for c in range(C):                               # gate multiply in I/O dtype
        o_ref[:, c, :, :] = x_ref[:, c, :, :] * gate


def _vmem_capacity_bytes():
    try:
        return int(pltpu.get_tpu_info().vmem_capacity_bytes)
    except Exception:
        return 64 * 1024 * 1024        # conservative: v7x per-TensorCore VMEM


def attention_module(x, weight, bias, *, target_block_bytes=4 * 1024 * 1024):
    """AttentionModule forward.  x: (B, C, H, W); weight: (1, C, 1, 1); bias: (1,)."""
    B, C, H, W = x.shape
    HW = H * W
    dtype = x.dtype
    dsize = jnp.dtype(dtype).itemsize

    # ---- present x as (B, C, S, L) with L a multiple of 128 -----------------
    pad = 0
    if W % 128 == 0:
        view, S, L = x, H, W                         # native layout, no copy
    elif HW % 128 == 0:
        S, L = HW // 128, 128
        view = x.reshape(B, C, S, 128)               # contiguous regrouping
    else:
        # TODO(synk): mask the ragged spatial tail in-kernel instead of this
        # wrapper-side pad/slice (each costs an extra HBM pass).
        pad = _round_up(HW, 128) - HW
        S, L = (HW + pad) // 128, 128
        view = jnp.pad(x.reshape(B, C, HW), ((0, 0), (0, 0), (0, pad)))
        view = view.reshape(B, C, S, 128)

    # ---- block sizing: multi-MiB steps within a per-generation VMEM budget --
    vmem_cap = _vmem_capacity_bytes()                # 128 MiB v5e/v6e, 64 MiB v7x
    vmem_limit = min(vmem_cap // 2, 64 * 1024 * 1024)
    ws_budget = (vmem_limit * 3) // 4                # headroom under the limit
    # Per block element: 2x input + 2x output (double-buffered) plus f32
    # temporaries (acc / att / gate, amortized over C) -- conservative.
    bytes_per_elem = 4 * dsize + 12
    row_elems = C * L                                # one sublane-row, all channels
    block_elems = min(max(target_block_bytes // dsize, row_elems),
                      max(ws_budget // bytes_per_elem, row_elems))
    want_rows = max(1, block_elems // row_elems)
    # TODO(synk): add channel tiling (partial-sum scratch) for very large C where
    # even a single 8-sublane-row block would exceed the VMEM budget.

    if want_rows >= S:
        # Whole spatial extent per step; fold batch rows to reach the target.
        ts = S
        desired_tb = max(1, min(B, want_rows // max(S, 1)))
        tb = 1
        for d in range(desired_tb, 0, -1):           # largest divisor of B <= desired
            if B % d == 0:
                tb = d
                break
    else:
        tb = 1
        ts = min(max(8, (want_rows // 8) * 8), S)    # multiple of 8, or == S

    nb = B // tb
    n_s = _cdiv(S, ts)

    # v7x megacore: best-effort nudge toward an even step count so the two
    # TensorCores get balanced work (only when spatial is already tiled).
    if (nb * n_s) % 2 == 1 and n_s > 1:
        ts_try = max(8, _round_up(_cdiv(S, n_s + 1), 8))
        if ts_try < ts:
            n_try = _cdiv(S, ts_try)
            if (nb * n_try) % 2 == 0:
                ts, n_s = ts_try, n_try

    w = jnp.asarray(weight, jnp.float32).reshape(C)
    b = jnp.asarray(bias, jnp.float32).reshape(1)

    cost = pl.CostEstimate(
        flops=B * HW * (3 * C + 2),                  # C FMA reduce + C gate muls
        transcendentals=2 * B * HW,                  # exp + reciprocal per pixel
        bytes_accessed=2 * B * C * HW * dsize,       # read x + write out
    )

    out_view = pl.pallas_call(
        _attention_kernel,
        out_shape=jax.ShapeDtypeStruct((B, C, S, L), dtype),
        grid_spec=pltpu.PrefetchScalarGridSpec(
            num_scalar_prefetch=0,
            grid=(nb, n_s),
            in_specs=[
                pl.BlockSpec((tb, C, ts, L), lambda bi, si: (bi, 0, si, 0)),
                pl.BlockSpec(memory_space=pltpu.MemorySpace.SMEM),   # conv weight
                pl.BlockSpec(memory_space=pltpu.MemorySpace.SMEM),   # conv bias
            ],
            out_specs=pl.BlockSpec((tb, C, ts, L), lambda bi, si: (bi, 0, si, 0)),
        ),
        compiler_params=pltpu.CompilerParams(
            dimension_semantics=("parallel", "parallel"),
            vmem_limit_bytes=vmem_limit,
        ),
        cost_estimate=cost,
    )(view, w, b)

    if pad:
        out_view = out_view.reshape(B, C, HW + pad)[:, :, :HW]
    return out_view.reshape(B, C, H, W)


def _reference(x, weight, bias):
    """Pure-JAX reference (same math, no Pallas)."""
    C = x.shape[1]
    att = jax.nn.sigmoid(
        jnp.sum(x * weight.reshape(1, C, 1, 1), axis=1, keepdims=True) + bias[0]
    )
    return x * att


if __name__ == "__main__":
    key = jax.random.PRNGKey(0)
    kx, kw, kb, kx2, kx3 = jax.random.split(key, 5)

    # --- primary test: shapes implied by the module --------------------------
    B, C, H, W = 2, 4, 16, 16
    x = jax.random.normal(kx, (B, C, H, W), dtype=jnp.float32)

    # Deterministic parameters (shapes match nn.Conv2d(C, 1, kernel_size=1)).
    fan_in = C
    bound = 1.0 / (fan_in ** 0.5)
    weight = jax.random.uniform(kw, (1, C, 1, 1), jnp.float32, -bound, bound)
    bias = jax.random.uniform(kb, (1,), jnp.float32, -bound, bound)

    out = jax.block_until_ready(attention_module(x, weight, bias))
    ref = _reference(x, weight, bias)
    assert jnp.allclose(out, ref, atol=5e-3, rtol=5e-3), "f32 mismatch vs reference"

    # --- bf16 I/O path (f32 accumulation, bf16 gate multiply) ----------------
    x_bf = x.astype(jnp.bfloat16)
    out_bf = jax.block_until_ready(attention_module(x_bf, weight, bias))
    assert out_bf.dtype == jnp.bfloat16
    ref_bf = _reference(x_bf.astype(jnp.float32), weight, bias)
    assert jnp.allclose(out_bf.astype(jnp.float32), ref_bf, atol=2e-2, rtol=2e-2), \
        "bf16 mismatch vs reference"

    # --- native-layout path (W % 128 == 0) with spatial tiling + partial tail
    x2 = jax.random.normal(kx2, (1, C, 88, 128), dtype=jnp.float32)
    out2 = jax.block_until_ready(
        attention_module(x2, weight, bias, target_block_bytes=64 * 1024))
    ref2 = _reference(x2, weight, bias)
    assert jnp.allclose(out2, ref2, atol=5e-3, rtol=5e-3), "tiled mismatch"

    # --- ragged HW (not a multiple of 128) -> padded fallback path -----------
    x3 = jax.random.normal(kx3, (2, C, 40, 40), dtype=jnp.float32)
    out3 = jax.block_until_ready(attention_module(x3, weight, bias))
    ref3 = _reference(x3, weight, bias)
    assert jnp.allclose(out3, ref3, atol=5e-3, rtol=5e-3), "padded-path mismatch"

    print("KERNEL_OK")
</pallas_src>

<mosaic_0001>
module attributes {stable_mosaic.version = 11 : i64} {
  func.func @_attention_kernel(%arg0: i32, %arg1: i32, %arg2: memref<2x4x2x128xf32, #tpu.memory_space<vmem>>, %arg3: memref<4xf32, #tpu.memory_space<smem>>, %arg4: memref<1xf32, #tpu.memory_space<smem>>, %arg5: memref<2x4x2x128xf32, #tpu.memory_space<vmem>>) attributes {dimension_semantics = [#tpu.dimension_semantics<parallel>, #tpu.dimension_semantics<parallel>], iteration_bounds = array<i64: 1, 1>, scalar_prefetch = 0 : i64, scratch_operands = 0 : i64, tpu.core_type = #tpu.core_type<tc>, window_params = [{transform_indices = @transform_0, window_bounds = array<i64: 2, 4, 2, 128>}, {transform_indices = @transform_1, window_bounds = array<i64: 4>}, {transform_indices = @transform_2, window_bounds = array<i64: 1>}, {transform_indices = @transform_3, window_bounds = array<i64: 2, 4, 2, 128>}]} {
    %c0 = arith.constant 0 : index
    %c0_0 = arith.constant 0 : index
    %c0_1 = arith.constant 0 : index
    %c0_2 = arith.constant 0 : index
    %0 = vector.load %arg2[%c0, %c0_0, %c0_1, %c0_2] : memref<2x4x2x128xf32, #tpu.memory_space<vmem>>, vector<2x1x2x128xf32>
    %1 = vector.shape_cast %0 : vector<2x1x2x128xf32> to vector<2x2x128xf32>
    %c0_3 = arith.constant 0 : index
    %2 = memref.load %arg3[%c0_3] : memref<4xf32, #tpu.memory_space<smem>>
    %3 = vector.broadcast %2 : f32 to vector<2x2x128xf32>
    %4 = arith.mulf %1, %3 : vector<2x2x128xf32>
    %c0_4 = arith.constant 0 : index
    %c1 = arith.constant 1 : index
    %c0_5 = arith.constant 0 : index
    %c0_6 = arith.constant 0 : index
    %5 = vector.load %arg2[%c0_4, %c1, %c0_5, %c0_6] : memref<2x4x2x128xf32, #tpu.memory_space<vmem>>, vector<2x1x2x128xf32>
    %6 = vector.shape_cast %5 : vector<2x1x2x128xf32> to vector<2x2x128xf32>
    %c1_7 = arith.constant 1 : index
    %7 = memref.load %arg3[%c1_7] : memref<4xf32, #tpu.memory_space<smem>>
    %8 = vector.broadcast %7 : f32 to vector<2x2x128xf32>
    %9 = arith.mulf %6, %8 : vector<2x2x128xf32>
    %10 = arith.addf %4, %9 : vector<2x2x128xf32>
    %c0_8 = arith.constant 0 : index
    %c2 = arith.constant 2 : index
    %c0_9 = arith.constant 0 : index
    %c0_10 = arith.constant 0 : index
    %11 = vector.load %arg2[%c0_8, %c2, %c0_9, %c0_10] : memref<2x4x2x128xf32, #tpu.memory_space<vmem>>, vector<2x1x2x128xf32>
    %12 = vector.shape_cast %11 : vector<2x1x2x128xf32> to vector<2x2x128xf32>
    %c2_11 = arith.constant 2 : index
    %13 = memref.load %arg3[%c2_11] : memref<4xf32, #tpu.memory_space<smem>>
    %14 = vector.broadcast %13 : f32 to vector<2x2x128xf32>
    %15 = arith.mulf %12, %14 : vector<2x2x128xf32>
    %16 = arith.addf %10, %15 : vector<2x2x128xf32>
    %c0_12 = arith.constant 0 : index
    %c3 = arith.constant 3 : index
    %c0_13 = arith.constant 0 : index
    %c0_14 = arith.constant 0 : index
    %17 = vector.load %arg2[%c0_12, %c3, %c0_13, %c0_14] : memref<2x4x2x128xf32, #tpu.memory_space<vmem>>, vector<2x1x2x128xf32>
    %18 = vector.shape_cast %17 : vector<2x1x2x128xf32> to vector<2x2x128xf32>
    %c3_15 = arith.constant 3 : index
    %19 = memref.load %arg3[%c3_15] : memref<4xf32, #tpu.memory_space<smem>>
    %20 = vector.broadcast %19 : f32 to vector<2x2x128xf32>
    %21 = arith.mulf %18, %20 : vector<2x2x128xf32>
    %22 = arith.addf %16, %21 : vector<2x2x128xf32>
    %c0_16 = arith.constant 0 : index
    %23 = memref.load %arg4[%c0_16] : memref<1xf32, #tpu.memory_space<smem>>
    %24 = vector.broadcast %23 : f32 to vector<2x2x128xf32>
    %25 = arith.addf %22, %24 : vector<2x2x128xf32>
    %cst = arith.constant 0.000000e+00 : f32
    %26 = vector.broadcast %cst : f32 to vector<2x2x128xf32>
    %27 = arith.subf %26, %25 : vector<2x2x128xf32>
    %28 = math.exp %27 : vector<2x2x128xf32>
    %cst_17 = arith.constant 1.000000e+00 : f32
    %29 = vector.broadcast %cst_17 : f32 to vector<2x2x128xf32>
    %30 = arith.addf %29, %28 : vector<2x2x128xf32>
    %31 = tpu.reciprocal %30 {approx = true} : vector<2x2x128xf32> -> vector<2x2x128xf32>
    %c0_18 = arith.constant 0 : index
    %c0_19 = arith.constant 0 : index
    %c0_20 = arith.constant 0 : index
    %c0_21 = arith.constant 0 : index
    %32 = vector.load %arg2[%c0_18, %c0_19, %c0_20, %c0_21] : memref<2x4x2x128xf32, #tpu.memory_space<vmem>>, vector<2x1x2x128xf32>
    %33 = vector.shape_cast %32 : vector<2x1x2x128xf32> to vector<2x2x128xf32>
    %34 = arith.mulf %33, %31 : vector<2x2x128xf32>
    %c0_22 = arith.constant 0 : index
    %c0_23 = arith.constant 0 : index
    %c0_24 = arith.constant 0 : index
    %c0_25 = arith.constant 0 : index
    %35 = vector.load %arg5[%c0_22, %c0_23, %c0_24, %c0_25] : memref<2x4x2x128xf32, #tpu.memory_space<vmem>>, vector<2x1x2x128xf32>
    %36 = vector.shape_cast %35 : vector<2x1x2x128xf32> to vector<2x2x128xf32>
    %37 = vector.shape_cast %34 : vector<2x2x128xf32> to vector<2x1x2x128xf32>
    tpu.vector_store %arg5[%c0_22, %c0_23, %c0_24, %c0_25], %37 {strides = array<i32>} : memref<2x4x2x128xf32, #tpu.memory_space<vmem>>, vector<2x1x2x128xf32>,
    %c0_26 = arith.constant 0 : index
    %c1_27 = arith.constant 1 : index
    %c0_28 = arith.constant 0 : index
    %c0_29 = arith.constant 0 : index
    %38 = vector.load %arg2[%c0_26, %c1_27, %c0_28, %c0_29] : memref<2x4x2x128xf32, #tpu.memory_space<vmem>>, vector<2x1x2x128xf32>
    %39 = vector.shape_cast %38 : vector<2x1x2x128xf32> to vector<2x2x128xf32>
    %40 = arith.mulf %39, %31 : vector<2x2x128xf32>
    %c0_30 = arith.constant 0 : index
    %c1_31 = arith.constant 1 : index
    %c0_32 = arith.constant 0 : index
    %c0_33 = arith.constant 0 : index
    %41 = vector.load %arg5[%c0_30, %c1_31, %c0_32, %c0_33] : memref<2x4x2x128xf32, #tpu.memory_space<vmem>>, vector<2x1x2x128xf32>
    %42 = vector.shape_cast %41 : vector<2x1x2x128xf32> to vector<2x2x128xf32>
    %43 = vector.shape_cast %40 : vector<2x2x128xf32> to vector<2x1x2x128xf32>
    tpu.vector_store %arg5[%c0_30, %c1_31, %c0_32, %c0_33], %43 {strides = array<i32>} : memref<2x4x2x128xf32, #tpu.memory_space<vmem>>, vector<2x1x2x128xf32>,
    %c0_34 = arith.constant 0 : index
    %c2_35 = arith.constant 2 : index
    %c0_36 = arith.constant 0 : index
    %c0_37 = arith.constant 0 : index
    %44 = vector.load %arg2[%c0_34, %c2_35, %c0_36, %c0_37] : memref<2x4x2x128xf32, #tpu.memory_space<vmem>>, vector<2x1x2x128xf32>
    %45 = vector.shape_cast %44 : vector<2x1x2x128xf32> to vector<2x2x128xf32>
    %46 = arith.mulf %45, %31 : vector<2x2x128xf32>
    %c0_38 = arith.constant 0 : index
    %c2_39 = arith.constant 2 : index
    %c0_40 = arith.constant 0 : index
    %c0_41 = arith.constant 0 : index
    %47 = vector.load %arg5[%c0_38, %c2_39, %c0_40, %c0_41] : memref<2x4x2x128xf32, #tpu.memory_space<vmem>>, vector<2x1x2x128xf32>
    %48 = vector.shape_cast %47 : vector<2x1x2x128xf32> to vector<2x2x128xf32>
    %49 = vector.shape_cast %46 : vector<2x2x128xf32> to vector<2x1x2x128xf32>
    tpu.vector_store %arg5[%c0_38, %c2_39, %c0_40, %c0_41], %49 {strides = array<i32>} : memref<2x4x2x128xf32, #tpu.memory_space<vmem>>, vector<2x1x2x128xf32>,
    %c0_42 = arith.constant 0 : index
    %c3_43 = arith.constant 3 : index
    %c0_44 = arith.constant 0 : index
    %c0_45 = arith.constant 0 : index
    %50 = vector.load %arg2[%c0_42, %c3_43, %c0_44, %c0_45] : memref<2x4x2x128xf32, #tpu.memory_space<vmem>>, vector<2x1x2x128xf32>
    %51 = vector.shape_cast %50 : vector<2x1x2x128xf32> to vector<2x2x128xf32>
    %52 = arith.mulf %51, %31 : vector<2x2x128xf32>
    %c0_46 = arith.constant 0 : index
    %c3_47 = arith.constant 3 : index
    %c0_48 = arith.constant 0 : index
    %c0_49 = arith.constant 0 : index
    %53 = vector.load %arg5[%c0_46, %c3_47, %c0_48, %c0_49] : memref<2x4x2x128xf32, #tpu.memory_space<vmem>>, vector<2x1x2x128xf32>
    %54 = vector.shape_cast %53 : vector<2x1x2x128xf32> to vector<2x2x128xf32>
    %55 = vector.shape_cast %52 : vector<2x2x128xf32> to vector<2x1x2x128xf32>
    tpu.vector_store %arg5[%c0_46, %c3_47, %c0_48, %c0_49], %55 {strides = array<i32>} : memref<2x4x2x128xf32, #tpu.memory_space<vmem>>, vector<2x1x2x128xf32>,
    return
  }
  func.func @transform_0(%arg0: i32, %arg1: i32) -> (i32, i32, i32, i32) {
    %c0_i32 = arith.constant 0 : i32
    %c0_i32_0 = arith.constant 0 : i32
    %c0_i32_1 = arith.constant 0 : i32
    return %arg0, %c0_i32, %arg1, %c0_i32_0 : i32, i32, i32, i32
  }
  func.func @transform_1(%arg0: i32, %arg1: i32) -> i32 {
    %c0_i32 = arith.constant 0 : i32
    %c0_i32_0 = arith.constant 0 : i32
    return %c0_i32 : i32
  }
  func.func @transform_2(%arg0: i32, %arg1: i32) -> i32 {
    %c0_i32 = arith.constant 0 : i32
    %c0_i32_0 = arith.constant 0 : i32
    return %c0_i32 : i32
  }
  func.func @transform_3(%arg0: i32, %arg1: i32) -> (i32, i32, i32, i32) {
    %c0_i32 = arith.constant 0 : i32
    %c0_i32_0 = arith.constant 0 : i32
    %c0_i32_1 = arith.constant 0 : i32
    return %arg0, %c0_i32, %arg1, %c0_i32_0 : i32, i32, i32, i32
  }
}

</mosaic_0001>

<bundles_post_ra>
// kernel: tpu_custom_call.1
= control target key start
LH: loop header
LB: loop body
LE: loop exit
PB: predicated region body
PF: predicated region fallthrough
CT: control target
= control target key end

     0   :  { %9 = vsyncpa [#allocation4], 0  ;;  %s262_s0 = inlined_call_operand.hbm [shape: f32[2,4,2,128], index: 0, kind: input, shape index: {}]   ;;  %s263_s1 = inlined_call_operand.vmem [shape: f32[4], index: 1, kind: input, shape index: {}]   ;;  %s264_s2 = inlined_call_operand.<no memory space> [shape: f32[1], index: 2, kind: input, shape index: {}]   ;;  %s265_s3 = inlined_call_operand.hbm [shape: f32[2,4,2,128], index: 3, kind: output, shape index: {}]  }
   0x1   :  { %10 = vsyncpa [#allocation6], 0 }
   0x2   :  { %11 = vsyncpa [#allocation5], 0  ;;  %s16_s14 = sshll.u32 %s262_s0, 4  ;;  %s219_s15 = smov [#allocation3]   ;;  %s17_s14 = int_to_ptr.hbm [resolvable:$true] %s16_s14 }
   0x3   :  { %s18_s16 = sshll.u32 %s219_s15, 4  ;;  %s30_s19 = sshll.u32 %s263_s1, 4  ;;  %s19_s16 = int_to_ptr.vmem [resolvable:$true] %s18_s16  ;;  %s31_s19 = int_to_ptr.vmem [resolvable:$true] %s30_s19 }
   0x4   :  { %s220_s20 = smov 32   ;;  %s221_s21 = smov 2  }
   0x5   :  { %24 = dma.hbm_to_vmem [thread:$0]  %s17_s14, 256, %s19_s16, [#allocation4], %s220_s20, %s220_s20, %s221_s21  }
   0x6   :  { %s222_s22 = smov [#allocation7]  }
   0x7   :  { %33 = dma.vmem_to_smem %s31_s19, 16, %s222_s22, [#allocation6]  }
   0x8   :  { %213 = dma.done.wait [#allocation4], 256  }
   0x9   :  { %214 = vsyncadd [#allocation4], 4294967040 }
   0xa   :  { %215 = dma.done.wait [#allocation6], 16  }
   0xb   :  { %216 = vsyncadd [#allocation6], 4294967280 }
   0xc   :  { %44 = sfence }
   0xd   :  { %s47_s0 = sld [smem:[#allocation7]]  ;;  %v45_v0 = vld [vmem:[#allocation3] sm:$0x3]  ;;  %v46_v1 = vld [vmem:[#allocation3 + $0x8] sm:$0x3]  ;;  %v79_v24 = vstv %s264_s2  ;;  %s223_s2 = smov [#allocation8]  }
   0xe   :  { %s137_s23 = sld [smem:[#allocation7 + $0x1]]  ;;  %v52_v2 = vld [vmem:[#allocation3 + $0x2] sm:$0x3]  ;;  %v53_v3 = vld [vmem:[#allocation3 + $0xa] sm:$0x3]  ;;  %s121_s27 = sshll.u32 %s223_s2, 4  ;;  %s122_s27 = int_to_ptr.vmem [resolvable:$true] %s121_s27 }
   0xf   :  { %s138_s24 = sld [smem:[#allocation7 + $0x2]]  ;;  %v61_v5 = vld [vmem:[#allocation3 + $0x4] sm:$0x3]  ;;  %v62_v6 = vld [vmem:[#allocation3 + $0xc] sm:$0x3]  ;;  %s123_s30 = sshll.u32 %s265_s3, 4  ;;  %s124_s30 = int_to_ptr.hbm [resolvable:$true] %s123_s30 }
  0x10   :  { %s139_s25 = sld [smem:[#allocation7 + $0x3]]  ;;  %v70_v9 = vld [vmem:[#allocation3 + $0x6] sm:$0x3]  ;;  %v71_v11 = vld [vmem:[#allocation3 + $0xe] sm:$0x3] }
  0x11   :  { %v96_v37 = vld [vmem:[#allocation3 + $0x2] sm:$0x3]  ;;  %v97_v38 = vld [vmem:[#allocation3 + $0xa] sm:$0x3]  ;;  %v103_v40 = vld [vmem:[#allocation3 + $0x4] sm:$0x3] }
  0x12   :  { %v104_v44 = vld [vmem:[#allocation3 + $0xc] sm:$0x3]  ;;  %v110_v47 = vld [vmem:[#allocation3 + $0x6] sm:$0x3]  ;;  %v111_v49 = vld [vmem:[#allocation3 + $0xe] sm:$0x3] }
  0x13   :  { %v48_v4 = vstv %s47_s0 }
  0x14   :  { %v49_v7 = vmul.f32 %v48_v4, %v45_v0  ;;  %v55_v8 = vstv %s137_s23  ;;  %v50_v10 = vmul.f32 %v48_v4, %v46_v1 }
  0x15   :  { %v56_v12 = vmul.f32 %v55_v8, %v52_v2  ;;  %v64_v13 = vstv %s138_s24  ;;  %v57_v14 = vmul.f32 %v55_v8, %v53_v3 }
  0x16   :  { %v65_v15 = vmul.f32 %v64_v13, %v61_v5  ;;  %v73_v16 = vstv %s139_s25  ;;  %v66_v17 = vmul.f32 %v64_v13, %v62_v6 }
  0x17   :  { %v58_v18 = vadd.f32 %v56_v12, %v49_v7  ;;  %v74_v19 = vmul.f32 %v73_v16, %v70_v9  ;;  %v59_v20 = vadd.f32 %v57_v14, %v50_v10  ;;  %v75_v21 = vmul.f32 %v73_v16, %v71_v11 }
  0x19   :  { %v67_v22 = vadd.f32 %v65_v15, %v58_v18  ;;  %v68_v23 = vadd.f32 %v66_v17, %v59_v20 }
  0x1b   :  { %v76_v25 = vadd.f32 %v74_v19, %v67_v22  ;;  %v77_v26 = vadd.f32 %v75_v21, %v68_v23 }
  0x1d   :  { %v80_v27 = vadd.f32 %v79_v24, %v76_v25  ;;  %v81_v28 = vadd.f32 %v79_v24, %v77_v26 }
  0x1f   :  { %v82_v29 = vsub.f32 0.0, %v80_v27  ;;  %v83_v30 = vsub.f32 0.0, %v81_v28 }
  0x21   :  { %v84_v31 = vmul.f32 1.442695, %v82_v29  ;;  %v86_v32 = vmul.f32 1.442695, %v83_v30 }
  0x23   :  { %145 = vpow2.f32 %v84_v31 }
  0x24   :  { %147 = vpow2.f32 %v86_v32 }
  0x29   :  { %v146_v33 = vpop.eup %145 }
  0x2a   :  { %v148_v34 = vpop.eup %147  ;;  %v88_v35 = vadd.f32 1.0, %v146_v33 }
  0x2b   :  { %v89_v36 = vadd.f32 1.0, %v148_v34 }
  0x2c   :  { %149 = vrcp.f32 %v88_v35 }
  0x2d   :  { %151 = vrcp.f32 %v89_v36 }
  0x32   :  { %v150_v39 = vpop.eup %149 }
  0x33   :  { %v152_v41 = vpop.eup %151  ;;  %v92_v42 = vmul.f32 %v150_v39, %v45_v0  ;;  %v98_v43 = vmul.f32 %v150_v39, %v96_v37  ;;  %v105_v48 = vmul.f32 %v150_v39, %v103_v40  ;;  %v112_v51 = vmul.f32 %v150_v39, %v110_v47 }
  0x34   :  { %v93_v45 = vmul.f32 %v152_v41, %v46_v1  ;;  %v99_v46 = vmul.f32 %v152_v41, %v97_v38  ;;  %v106_v50 = vmul.f32 %v152_v41, %v104_v44  ;;  %v113_v52 = vmul.f32 %v152_v41, %v111_v49 }
  0x35   :  { %94 = vst [vmem:[#allocation8] sm:$0x3] %v92_v42 }
  0x36   :  { %95 = vst [vmem:[#allocation8 + $0x8] sm:$0x3] %v93_v45 }
  0x37   :  { %101 = vst [vmem:[#allocation8 + $0x2] sm:$0x3] %v98_v43 }
  0x38   :  { %102 = vst [vmem:[#allocation8 + $0xa] sm:$0x3] %v99_v46 }
  0x39   :  { %108 = vst [vmem:[#allocation8 + $0x4] sm:$0x3] %v105_v48 }
  0x3a   :  { %109 = vst [vmem:[#allocation8 + $0xc] sm:$0x3] %v106_v50 }
  0x3b   :  { %115 = vst [vmem:[#allocation8 + $0x6] sm:$0x3] %v112_v51 }
  0x3c   :  { %116 = vst [vmem:[#allocation8 + $0xe] sm:$0x3] %v113_v52 }
  0x3d   :  { %129 = dma.vmem_to_hbm [thread:$0]  %s122_s27, 256, %s124_s30, [#allocation5], %s220_s20, %s220_s20, %s221_s21  }
  0x3e   :  { %217 = dma.done.wait [#allocation5], 256  }
  0x3f   :  { %218 = vsyncadd [#allocation5], 4294967040 }
  0x40   :  { %134 = vsyncpa [#allocation4], 1 }
  0x41   :  { %135 = vsyncpa [#allocation5], 1 }
  0x42   :  { %136 = vsyncpa [#allocation6], 1 }

</bundles_post_ra>
